<compile_context>
chip_gen: v7x
topology: tpu7x:2x2x1
jax: 0.10.0
libtpu: 0.0.40
codegen_flags: <defaults>
</compile_context>

<pallas_src>
import jax
import jax.numpy as jnp
from jax.experimental import pallas as pl
from jax.experimental.pallas import tpu as pltpu

LANES = 128
MAX_ROW_TILE = 4096  # 4096 x 128 x 4B = 2 MiB per f32 block (1 MiB for bf16)


def _pact_kernel(alpha_ref, x_ref, o_ref):
    # alpha_ref: SMEM scalar (shape (1,), f32). x_ref/o_ref: VMEM tiles (native dtype).
    alpha = alpha_ref[0].astype(x_ref.dtype)
    zero = jnp.zeros((), dtype=x_ref.dtype)
    x = x_ref[...]
    # PACT forward == clamp(x, 0, alpha); clamp is exact and only 2 VPU ops.
    o_ref[...] = jnp.minimum(jnp.maximum(x, zero), alpha)


def pact(x: jax.Array, alpha: jax.Array) -> jax.Array:
    """PACT forward. x: any shape (e.g. NCHW), alpha: scalar f32 parameter."""
    orig_shape = x.shape
    dtype = x.dtype

    flat = x.reshape(-1)
    n = flat.shape[0]

    # Pad only up to a lane (128) multiple if needed; Pallas masks any ragged
    # trailing row-block, so no ROW_TILE-sized padding is required.
    n_pad = pl.cdiv(n, LANES) * LANES
    padded = n_pad != n
    if padded:
        flat = jnp.pad(flat, (0, n_pad - n))

    rows = n_pad // LANES
    x2d = flat.reshape(rows, LANES)

    if rows <= MAX_ROW_TILE:
        # Full-extent block along rows (legal even if not a multiple of 8).
        row_tile = rows
    else:
        # Large multiple-of-8 tile; last block may be partial (masked by Pallas).
        row_tile = MAX_ROW_TILE

    grid = (pl.cdiv(rows, row_tile),)

    alpha_arr = jnp.asarray(alpha, dtype=jnp.float32).reshape((1,))

    out2d = pl.pallas_call(
        _pact_kernel,
        out_shape=jax.ShapeDtypeStruct((rows, LANES), dtype),
        grid_spec=pltpu.PrefetchScalarGridSpec(
            num_scalar_prefetch=0,
            grid=grid,
            in_specs=[
                pl.BlockSpec(memory_space=pltpu.MemorySpace.SMEM),  # alpha scalar
                pl.BlockSpec((row_tile, LANES), lambda i: (i, 0)),
            ],
            out_specs=pl.BlockSpec((row_tile, LANES), lambda i: (i, 0)),
        ),
        compiler_params=pltpu.CompilerParams(
            dimension_semantics=("parallel",),
        ),
    )(alpha_arr, x2d)

    out_flat = out2d.reshape(-1)
    if padded:
        out_flat = out_flat[:n]
    return out_flat.reshape(orig_shape)


class PACTModule:
    """JAX mirror of the PyTorch PACT module (alpha initialized to 10.0)."""

    def __init__(self):
        self.alpha = jnp.float32(10.0)

    def __call__(self, x):
        return pact(x, self.alpha)


if __name__ == "__main__":
    key = jax.random.PRNGKey(0)
    # Small NCHW input consistent with a conv-activation use of PACT.
    x = jax.random.normal(key, (2, 4, 16, 16), dtype=jnp.float32) * 8.0

    module = PACTModule()
    y = module(x)
    y = jax.block_until_ready(y)

    # Reference check (plain JAX): clamp(x, 0, alpha)
    ref = jnp.clip(x, 0.0, module.alpha)
    assert y.shape == x.shape and y.dtype == x.dtype
    assert jnp.allclose(y, ref, atol=1e-6), "mismatch vs reference"

    print("KERNEL_OK")
</pallas_src>

<mosaic_0001>
module attributes {stable_mosaic.version = 11 : i64} {
  func.func @_pact_kernel(%arg0: i32, %arg1: memref<1xf32, #tpu.memory_space<smem>>, %arg2: memref<16x128xf32, #tpu.memory_space<vmem>>, %arg3: memref<16x128xf32, #tpu.memory_space<vmem>>) attributes {dimension_semantics = [#tpu.dimension_semantics<parallel>], iteration_bounds = array<i64: 1>, scalar_prefetch = 0 : i64, scratch_operands = 0 : i64, tpu.core_type = #tpu.core_type<tc>, window_params = [{transform_indices = @transform_0, window_bounds = array<i64: 1>}, {transform_indices = @transform_1, window_bounds = array<i64: 16, 128>}, {transform_indices = @transform_2, window_bounds = array<i64: 16, 128>}]} {
    %c0 = arith.constant 0 : index
    %0 = memref.load %arg1[%c0] : memref<1xf32, #tpu.memory_space<smem>>
    %c0_0 = arith.constant 0 : index
    %c0_1 = arith.constant 0 : index
    %1 = vector.load %arg2[%c0_0, %c0_1] : memref<16x128xf32, #tpu.memory_space<vmem>>, vector<16x128xf32>
    %cst = arith.constant 0.000000e+00 : f32
    %2 = vector.broadcast %cst : f32 to vector<16x128xf32>
    %3 = arith.maximumf %1, %2 : vector<16x128xf32>
    %4 = vector.broadcast %0 : f32 to vector<16x128xf32>
    %5 = arith.minimumf %3, %4 : vector<16x128xf32>
    %c0_2 = arith.constant 0 : index
    %c0_3 = arith.constant 0 : index
    %6 = vector.load %arg3[%c0_2, %c0_3] : memref<16x128xf32, #tpu.memory_space<vmem>>, vector<16x128xf32>
    tpu.vector_store %arg3[%c0_2, %c0_3], %5 {strides = array<i32>} : memref<16x128xf32, #tpu.memory_space<vmem>>, vector<16x128xf32>,
    return
  }
  func.func @transform_0(%arg0: i32) -> i32 {
    %c0_i32 = arith.constant 0 : i32
    %c0_i32_0 = arith.constant 0 : i32
    return %c0_i32 : i32
  }
  func.func @transform_1(%arg0: i32) -> (i32, i32) {
    %c0_i32 = arith.constant 0 : i32
    %c0_i32_0 = arith.constant 0 : i32
    return %arg0, %c0_i32 : i32, i32
  }
  func.func @transform_2(%arg0: i32) -> (i32, i32) {
    %c0_i32 = arith.constant 0 : i32
    %c0_i32_0 = arith.constant 0 : i32
    return %arg0, %c0_i32 : i32, i32
  }
}

</mosaic_0001>

<bundles_post_ra>
// kernel: tpu_custom_call.1
= control target key start
LH: loop header
LB: loop body
LE: loop exit
PB: predicated region body
PF: predicated region fallthrough
CT: control target
= control target key end

     0   :  { %8 = vsyncpa [#allocation4], 0  ;;  %s158_s0 = inlined_call_operand.<no memory space> [shape: f32[1], index: 0, kind: input, shape index: {}]   ;;  %s159_s1 = inlined_call_operand.hbm [shape: f32[16,128], index: 1, kind: input, shape index: {}]   ;;  %s160_s2 = inlined_call_operand.hbm [shape: f32[16,128], index: 2, kind: output, shape index: {}]  }
   0x1   :  { %9 = vsyncpa [#allocation5], 0  ;;  %s106_s9 = smov [#allocation3]   ;;  %s58_s13 = scalar_lea.hbm %s159_s1, 256 }
   0x2   :  { %s17_s10 = sshll.u32 %s106_s9, 4  ;;  %p59_p0 = scmp.ne.s32.totalorder %s159_s1, %s58_s13  ;;  %s18_s10 = int_to_ptr.vmem [resolvable:$true] %s17_s10 }
   0x3   :  { %p62_p1 = scmp.lt.u32.totalorder %s58_s13, %s159_s1 }
   0x5   :  { %p64_p2 = pnand %p62_p1, %p59_p0 }
   0x7   :  { %67 = shalt.err (!%p64_p2)
}
   0x8   :  { %s68_s18 = scalar_lea.vmem %s18_s10, 256  ;;  %p73_p4 = scmp.lt.s32.totalorder %s18_s10, %s18_s10 }
   0x9   :  { %p69_p3 = scmp.ne.s32.totalorder %s18_s10, %s68_s18  ;;  %p74_p5 = scmp.lt.s32.totalorder %s68_s18, %s68_s18 }
   0xb   :  { %p75_p6 = por %p74_p5, %p73_p4 }
   0xd   :  { %p76_p7 = pnand %p75_p6, %p69_p3 }
   0xf   :  { %79 = shalt.err (!%p76_p7)
}
  0x10   :  { %s107_s19 = smov 128   ;;  %s108_s20 = smov 8  }
  0x11   :  { %23 = dma.hbm_to_vmem [thread:$0]  %s159_s1, 256, %s18_s10, [#allocation4], %s107_s19, %s107_s19, %s108_s20  }
  0x12   :  { %102 = dma.done.wait [#allocation4], 256  }
  0x13   :  { %103 = vsyncadd [#allocation4], 4294967040  ;;  %v28_v0 = vld [vmem:[#allocation3] sm:$0xff]  ;;  %v32_v1 = vstv %s158_s0  ;;  %v29_v2 = vld [vmem:[#allocation3 + $0x8] sm:$0xff]  ;;  %s109_s25 = smov [#allocation6]  }
  0x14   :  { %s42_s26 = sshll.u32 %s109_s25, 4  ;;  %v30_v3 = vmax.f32 %v28_v0, 0.0  ;;  %v31_v4 = vmax.f32 %v29_v2, 0.0  ;;  %s43_s26 = int_to_ptr.vmem [resolvable:$true] %s42_s26 }
  0x15   :  { %s80_s27 = scalar_lea.vmem %s43_s26, 256  ;;  %p85_p9 = scmp.lt.s32.totalorder %s43_s26, %s43_s26 }
  0x16   :  { %v33_v5 = vmin.f32 %v30_v3, %v32_v1  ;;  %v34_v6 = vmin.f32 %v31_v4, %v32_v1  ;;  %p81_p8 = scmp.ne.s32.totalorder %s43_s26, %s80_s27  ;;  %p86_p10 = scmp.lt.s32.totalorder %s80_s27, %s80_s27 }
  0x18   :  { %35 = vst [vmem:[#allocation6] sm:$0xff] %v33_v5  ;;  %36 = vst [vmem:[#allocation6 + $0x8] sm:$0xff] %v34_v6  ;;  %p87_p11 = por %p86_p10, %p85_p9 }
  0x1a   :  { %p88_p12 = pnand %p87_p11, %p81_p8 }
  0x1c   :  { %91 = shalt.err (!%p88_p12)
}
  0x1d   :  { %s92_s0 = scalar_lea.hbm %s160_s2, 256 }
  0x1e   :  { %p93_p13 = scmp.ne.s32.totalorder %s160_s2, %s92_s0  ;;  %p96_p0 = scmp.lt.u32.totalorder %s92_s0, %s160_s2 }
  0x20   :  { %p98_p1 = pnand %p96_p0, %p93_p13 }
  0x22   :  { %101 = shalt.err (!%p98_p1)
}
  0x23   :  { %48 = dma.vmem_to_hbm [thread:$0]  %s43_s26, 256, %s160_s2, [#allocation5], %s107_s19, %s107_s19, %s108_s20  }
  0x24   :  { %104 = dma.done.wait [#allocation5], 256  }
  0x25   :  { %105 = vsyncadd [#allocation5], 4294967040 }
  0x26   :  { %52 = vsyncpa [#allocation4], 1 }
  0x27   :  { %53 = vsyncpa [#allocation5], 1 }

</bundles_post_ra>
